<compile_context>
chip_gen: v7x
topology: tpu7x:2x2x1
jax: 0.10.0
libtpu: 0.0.40
codegen_flags: <defaults>
</compile_context>

<pallas_src>
import jax
import jax.numpy as jnp
from jax import lax
from jax.experimental import pallas as pl
from jax.experimental.pallas import tpu as pltpu

NEG_FILL = -100000000000.0  # matches torch's fill_(-1e11)


def _mas_forward_kernel(off_ref, x_ref, w1_ref, b1_ref, w2_ref, b2_ref, o_ref):
    """off_ref: SMEM int32[2] = (offset1, offset2) via scalar prefetch.

    x_ref is f32 (cast to bf16 in-kernel); w1_ref/w2_ref are bf16 (MXU
    inputs); b1_ref/b2_ref/o_ref are f32.
    """
    # Layer 1: Linear + ReLU  (bf16 MXU matmul, f32 accumulation; VPU ops f32)
    x_bf = x_ref[...].astype(jnp.bfloat16)
    h = jnp.dot(x_bf, w1_ref[...], preferred_element_type=jnp.float32)
    h = jnp.maximum(h + b1_ref[...], 0.0)

    # Layer 2: Linear (cast activations back to bf16 for the MXU)
    logits = jnp.dot(h.astype(w2_ref.dtype), w2_ref[...],
                     preferred_element_type=jnp.float32) + b2_ref[...]

    # Task-offset masking: columns outside [offset1, offset2) -> -1e11.
    # Mask is constant along the batch axis -> build one (1, n_out) row and
    # let jnp.where broadcast it over the TB rows.
    off1 = off_ref[0]
    off2 = off_ref[1]
    col = lax.broadcasted_iota(jnp.int32, (1, logits.shape[-1]), 1)
    keep = (col >= off1) & (col < off2)
    o_ref[...] = jnp.where(keep, logits, NEG_FILL).astype(o_ref.dtype)


def prepare_params(params):
    """One-time prep: cast weights to bf16 for the MXU (hoisted out of the
    per-call path). Biases stay f32."""
    w1, b1, w2, b2 = params
    return (w1.astype(jnp.bfloat16), b1, w2.astype(jnp.bfloat16), b2)


def mas_net_forward(x, prepared_params, t, *, n_tasks, n_outputs, block_b=1024):
    """Forward pass of Net.forward(x, t) with the MLP backbone.

    x: f32[B, n_inputs]; prepared_params from prepare_params(); t: python int.
    Returns f32[B, n_outputs].
    """
    w1, b1, w2, b2 = prepared_params
    B, n_in = x.shape
    nh = w1.shape[1]
    assert w2.shape == (nh, n_outputs)
    assert b1.shape == (1, nh) and b2.shape == (1, n_outputs)

    # Offsets exactly as the module computes them (float division + int()).
    nc_per_task = n_outputs / n_tasks
    offset1 = int(t * nc_per_task)
    offset2 = int((t + 1) * nc_per_task)
    offsets = jnp.array([offset1, offset2], dtype=jnp.int32)

    # --- Batch tiling -------------------------------------------------------
    # TB: multiple of 8 (sublane), at most block_b, and chosen so that for
    # B > 8 the grid has >= 2 steps (lets dimension_semantics=("parallel",)
    # shard across both TensorCores on v7x; costless on v5e/v6e).
    half = ((pl.cdiv(B, 2) + 7) // 8) * 8
    TB = max(8, min(block_b, half))
    grid_b = pl.cdiv(B, TB)
    # No row padding of x: Pallas pads the ragged final input block and masks
    # OOB output-row writes; rows are independent so this is safe.

    grid_spec = pltpu.PrefetchScalarGridSpec(
        num_scalar_prefetch=1,
        grid=(grid_b,),
        in_specs=[
            pl.BlockSpec((TB, n_in), lambda i, off: (i, 0)),          # x tile
            pl.BlockSpec((n_in, nh), lambda i, off: (0, 0)),          # w1 (resident)
            pl.BlockSpec((1, nh), lambda i, off: (0, 0)),             # b1 (resident)
            pl.BlockSpec((nh, n_outputs), lambda i, off: (0, 0)),     # w2 (resident)
            pl.BlockSpec((1, n_outputs), lambda i, off: (0, 0)),      # b2 (resident)
        ],
        out_specs=pl.BlockSpec((TB, n_outputs), lambda i, off: (i, 0)),
    )

    out = pl.pallas_call(
        _mas_forward_kernel,
        out_shape=jax.ShapeDtypeStruct((B, n_outputs), jnp.float32),
        grid_spec=grid_spec,
        compiler_params=pltpu.CompilerParams(
            dimension_semantics=("parallel",)),
    )(offsets, x, w1, b1, w2, b2)

    return out


def init_params(key, n_inputs, n_hiddens, n_outputs):
    k1, k2, k3, k4 = jax.random.split(key, 4)
    scale1 = 1.0 / jnp.sqrt(n_inputs)
    scale2 = 1.0 / jnp.sqrt(n_hiddens)
    w1 = jax.random.uniform(k1, (n_inputs, n_hiddens), jnp.float32,
                            -scale1, scale1)
    b1 = jax.random.uniform(k2, (1, n_hiddens), jnp.float32, -scale1, scale1)
    w2 = jax.random.uniform(k3, (n_hiddens, n_outputs), jnp.float32,
                            -scale2, scale2)
    b2 = jax.random.uniform(k4, (1, n_outputs), jnp.float32, -scale2, scale2)
    return (w1, b1, w2, b2)


def _reference(x, params, t, *, n_tasks, n_outputs):
    """Pure-JAX reference with matched bf16-matmul / f32-accumulate numerics."""
    w1, b1, w2, b2 = params
    h = jnp.dot(x.astype(jnp.bfloat16), w1.astype(jnp.bfloat16),
                preferred_element_type=jnp.float32)
    h = jnp.maximum(h + b1, 0.0)
    ref = jnp.dot(h.astype(jnp.bfloat16), w2.astype(jnp.bfloat16),
                  preferred_element_type=jnp.float32) + b2
    nc = n_outputs / n_tasks
    o1, o2 = int(t * nc), int((t + 1) * nc)
    if o1 > 0:
        ref = ref.at[:, :o1].set(NEG_FILL)
    if o2 < n_outputs:
        ref = ref.at[:, o2:].set(NEG_FILL)
    return ref


if __name__ == "__main__":
    # Small shapes consistent with the module's constructor:
    # n_inputs=32, n_hiddens=64, n_outputs=16, n_tasks=4 -> nc_per_task=4
    n_inputs, n_hiddens, n_outputs, n_tasks = 32, 64, 16, 4
    task = 1  # current task id

    key = jax.random.PRNGKey(0)
    kx, kp, kx2, kx3 = jax.random.split(key, 4)
    params = init_params(kp, n_inputs, n_hiddens, n_outputs)
    prepared = prepare_params(params)

    # Case 1: tiny batch (single grid step).
    B = 8
    x = jax.random.normal(kx, (B, n_inputs), dtype=jnp.float32)
    out = mas_net_forward(x, prepared, task, n_tasks=n_tasks,
                          n_outputs=n_outputs)
    out = jax.block_until_ready(out)
    ref = _reference(x, params, task, n_tasks=n_tasks, n_outputs=n_outputs)
    assert out.shape == (B, n_outputs)
    assert jnp.allclose(out, ref, atol=1e-3, rtol=1e-3), "mismatch (B=8)"

    # Case 2: batch not a multiple of the tile -> exercises the ragged final
    # block (masked output writes, padded input block).
    B2 = 200
    x2 = jax.random.normal(kx2, (B2, n_inputs), dtype=jnp.float32)
    out2 = mas_net_forward(x2, prepared, task, n_tasks=n_tasks,
                           n_outputs=n_outputs)
    out2 = jax.block_until_ready(out2)
    ref2 = _reference(x2, params, task, n_tasks=n_tasks, n_outputs=n_outputs)
    assert out2.shape == (B2, n_outputs)
    assert jnp.allclose(out2, ref2, atol=1e-3, rtol=1e-3), "mismatch (B=200)"

    # Case 3: larger batch exercising the pipelined / parallel batch grid.
    B3 = 256
    x3 = jax.random.normal(kx3, (B3, n_inputs), dtype=jnp.float32)
    out3 = mas_net_forward(x3, prepared, task, n_tasks=n_tasks,
                           n_outputs=n_outputs)
    out3 = jax.block_until_ready(out3)
    ref3 = _reference(x3, params, task, n_tasks=n_tasks, n_outputs=n_outputs)
    assert out3.shape == (B3, n_outputs)
    assert jnp.allclose(out3, ref3, atol=1e-3, rtol=1e-3), "mismatch (B=256)"

    # TODO(synk): observe() (MAS-style regularized training step / backward)
    # is an optimizer routine, not part of the forward pass; not ported.
    print("KERNEL_OK")
</pallas_src>

<mosaic_0001>
module attributes {stable_mosaic.version = 11 : i64} {
  func.func @_mas_forward_kernel(%arg0: i32, %arg1: memref<2xi32, #tpu.memory_space<smem>>, %arg2: memref<8x32xf32, #tpu.memory_space<vmem>>, %arg3: memref<32x64xbf16, #tpu.memory_space<vmem>>, %arg4: memref<1x64xf32, #tpu.memory_space<vmem>>, %arg5: memref<64x16xbf16, #tpu.memory_space<vmem>>, %arg6: memref<1x16xf32, #tpu.memory_space<vmem>>, %arg7: memref<8x16xf32, #tpu.memory_space<vmem>>) attributes {dimension_semantics = [#tpu.dimension_semantics<parallel>], iteration_bounds = array<i64: 1>, scalar_prefetch = 1 : i64, scratch_operands = 0 : i64, tpu.core_type = #tpu.core_type<tc>, window_params = [{transform_indices = @transform_0, window_bounds = array<i64: 8, 32>}, {pipeline_mode = #tpu.pipeline_mode<synchronous>, transform_indices = @transform_1, window_bounds = array<i64: 32, 64>}, {pipeline_mode = #tpu.pipeline_mode<synchronous>, transform_indices = @transform_2, window_bounds = array<i64: 1, 64>}, {pipeline_mode = #tpu.pipeline_mode<synchronous>, transform_indices = @transform_3, window_bounds = array<i64: 64, 16>}, {pipeline_mode = #tpu.pipeline_mode<synchronous>, transform_indices = @transform_4, window_bounds = array<i64: 1, 16>}, {transform_indices = @transform_5, window_bounds = array<i64: 8, 16>}]} {
    %c0 = arith.constant 0 : index
    %c0_0 = arith.constant 0 : index
    %0 = vector.load %arg2[%c0, %c0_0] : memref<8x32xf32, #tpu.memory_space<vmem>>, vector<8x32xf32>
    %1 = arith.truncf %0 : vector<8x32xf32> to vector<8x32xbf16>
    %c0_1 = arith.constant 0 : index
    %c0_2 = arith.constant 0 : index
    %2 = vector.load %arg3[%c0_1, %c0_2] : memref<32x64xbf16, #tpu.memory_space<vmem>>, vector<32x64xbf16>
    %cst = arith.constant dense<0.000000e+00> : vector<8x64xf32>
    %3 = tpu.matmul %1, %2, %cst {dimension_numbers = #tpu.dot_dimension_numbers<[1], [0], [0], [1], [0, 0, 1, 1], [], []>} : vector<8x32xbf16>, vector<32x64xbf16>, vector<8x64xf32> -> vector<8x64xf32>
    %c0_3 = arith.constant 0 : index
    %c0_4 = arith.constant 0 : index
    %4 = vector.load %arg4[%c0_3, %c0_4] : memref<1x64xf32, #tpu.memory_space<vmem>>, vector<1x64xf32>
    %5 = vector.broadcast %4 : vector<1x64xf32> to vector<8x64xf32>
    %6 = arith.addf %3, %5 : vector<8x64xf32>
    %cst_5 = arith.constant 0.000000e+00 : f32
    %7 = vector.broadcast %cst_5 : f32 to vector<8x64xf32>
    %8 = arith.maximumf %6, %7 : vector<8x64xf32>
    %9 = arith.truncf %8 : vector<8x64xf32> to vector<8x64xbf16>
    %c0_6 = arith.constant 0 : index
    %c0_7 = arith.constant 0 : index
    %10 = vector.load %arg5[%c0_6, %c0_7] : memref<64x16xbf16, #tpu.memory_space<vmem>>, vector<64x16xbf16>
    %cst_8 = arith.constant dense<0.000000e+00> : vector<8x16xf32>
    %11 = tpu.matmul %9, %10, %cst_8 {dimension_numbers = #tpu.dot_dimension_numbers<[1], [0], [0], [1], [0, 0, 1, 1], [], []>} : vector<8x64xbf16>, vector<64x16xbf16>, vector<8x16xf32> -> vector<8x16xf32>
    %c0_9 = arith.constant 0 : index
    %c0_10 = arith.constant 0 : index
    %12 = vector.load %arg6[%c0_9, %c0_10] : memref<1x16xf32, #tpu.memory_space<vmem>>, vector<1x16xf32>
    %13 = vector.broadcast %12 : vector<1x16xf32> to vector<8x16xf32>
    %14 = arith.addf %11, %13 : vector<8x16xf32>
    %c0_11 = arith.constant 0 : index
    %15 = memref.load %arg1[%c0_11] : memref<2xi32, #tpu.memory_space<smem>>
    %c1 = arith.constant 1 : index
    %16 = memref.load %arg1[%c1] : memref<2xi32, #tpu.memory_space<smem>>
    %17 = tpu.iota {dimensions = array<i32: 1>} : vector<1x16xi32>
    %18 = vector.broadcast %15 : i32 to vector<1x16xi32>
    %19 = arith.cmpi sge, %17, %18 : vector<1x16xi32>
    %20 = vector.broadcast %16 : i32 to vector<1x16xi32>
    %21 = arith.cmpi slt, %17, %20 : vector<1x16xi32>
    %22 = arith.andi %19, %21 : vector<1x16xi1>
    %cst_12 = arith.constant -9.99999979E+10 : f32
    %23 = vector.shape_cast %22 : vector<1x16xi1> to vector<1x16xi1>
    %24 = vector.broadcast %23 : vector<1x16xi1> to vector<8x16xi1>
    %25 = vector.broadcast %cst_12 : f32 to vector<8x16xf32>
    %26 = arith.select %24, %14, %25 : vector<8x16xi1>, vector<8x16xf32>
    %c0_13 = arith.constant 0 : index
    %c0_14 = arith.constant 0 : index
    %27 = vector.load %arg7[%c0_13, %c0_14] : memref<8x16xf32, #tpu.memory_space<vmem>>, vector<8x16xf32>
    tpu.vector_store %arg7[%c0_13, %c0_14], %26 {strides = array<i32>} : memref<8x16xf32, #tpu.memory_space<vmem>>, vector<8x16xf32>,
    return
  }
  func.func @transform_0(%arg0: i32, %arg1: memref<2xi32, #tpu.memory_space<smem>>) -> (i32, i32) {
    %c0_i32 = arith.constant 0 : i32
    %c0_i32_0 = arith.constant 0 : i32
    return %arg0, %c0_i32 : i32, i32
  }
  func.func @transform_1(%arg0: i32, %arg1: memref<2xi32, #tpu.memory_space<smem>>) -> (i32, i32) {
    %c0_i32 = arith.constant 0 : i32
    %c0_i32_0 = arith.constant 0 : i32
    %c0_i32_1 = arith.constant 0 : i32
    return %c0_i32, %c0_i32_0 : i32, i32
  }
  func.func @transform_2(%arg0: i32, %arg1: memref<2xi32, #tpu.memory_space<smem>>) -> (i32, i32) {
    %c0_i32 = arith.constant 0 : i32
    %c0_i32_0 = arith.constant 0 : i32
    %c0_i32_1 = arith.constant 0 : i32
    return %c0_i32, %c0_i32_0 : i32, i32
  }
  func.func @transform_3(%arg0: i32, %arg1: memref<2xi32, #tpu.memory_space<smem>>) -> (i32, i32) {
    %c0_i32 = arith.constant 0 : i32
    %c0_i32_0 = arith.constant 0 : i32
    %c0_i32_1 = arith.constant 0 : i32
    return %c0_i32, %c0_i32_0 : i32, i32
  }
  func.func @transform_4(%arg0: i32, %arg1: memref<2xi32, #tpu.memory_space<smem>>) -> (i32, i32) {
    %c0_i32 = arith.constant 0 : i32
    %c0_i32_0 = arith.constant 0 : i32
    %c0_i32_1 = arith.constant 0 : i32
    return %c0_i32, %c0_i32_0 : i32, i32
  }
  func.func @transform_5(%arg0: i32, %arg1: memref<2xi32, #tpu.memory_space<smem>>) -> (i32, i32) {
    %c0_i32 = arith.constant 0 : i32
    %c0_i32_0 = arith.constant 0 : i32
    return %arg0, %c0_i32 : i32, i32
  }
}

</mosaic_0001>

<bundles_post_ra>
// kernel: tpu_custom_call.1
= control target key start
LH: loop header
LB: loop body
LE: loop exit
PB: predicated region body
PF: predicated region fallthrough
CT: control target
= control target key end

     0   :  { %s379_s0 = inlined_call_operand.vmem [shape: s32[2], index: 0, kind: input, shape index: {}]   ;;  %s380_s1 = inlined_call_operand.vmem [shape: f32[8,32], index: 1, kind: input, shape index: {}]   ;;  %s381_s2 = inlined_call_operand.vmem [shape: bf16[32,64], index: 2, kind: input, shape index: {}]   ;;  %s382_s3 = inlined_call_operand.vmem [shape: f32[1,64], index: 3, kind: input, shape index: {}]   ;;  %s383_s4 = inlined_call_operand.vmem [shape: bf16[64,16], index: 4, kind: input, shape index: {}]   ;;  %s384_s5 = inlined_call_operand.vmem [shape: f32[1,16], index: 5, kind: input, shape index: {}]   ;;  %s385_s6 = inlined_call_operand.hbm [shape: f32[8,16], index: 6, kind: output, shape index: {}]  }
   0x1   :  { %s11_s23 = sshll.u32 %s379_s0, 4  ;;  %s12_s23 = int_to_ptr.vmem [resolvable:$true] %s11_s23 }
   0x2   :  { %s260_s24 = scalar_lea.vmem %s12_s23, 16  ;;  %p265_p1 = scmp.lt.s32.totalorder %s12_s23, %s12_s23 }
   0x3   :  { %p261_p0 = scmp.ne.s32.totalorder %s12_s23, %s260_s24  ;;  %p266_p2 = scmp.lt.s32.totalorder %s260_s24, %s260_s24 }
   0x5   :  { %p267_p3 = por %p266_p2, %p265_p1 }
   0x7   :  { %p268_p4 = pnand %p267_p3, %p261_p0 }
   0x9   :  { %271 = shalt.err (!%p268_p4)  }
   0xa   :  { %s298_s25 = smov [#allocation3]  }
   0xb   :  { %14 = dma.vmem_to_smem %s12_s23, 16, %s298_s25, [#allocation2] }
   0xc   :  { %294 = dma.done.wait [#allocation2], 16 }
   0xd   :  { %295 = vsyncadd [#allocation2], 4294967280 }
   0xe   :  { %16 = sfence }
   0xf   :  { %v254_v0 = vld [vmem:[%s381_s2] sm:$0xff]   ;;  %v299_v1 = vmov 0.0   ;;  %v255_v2 = vld [vmem:[%s381_s2 + $0x8] sm:$0xff]   ;;  %vm300_vm0 = vmmov 0   ;;  %vm54_vm1 = vcmask 261120  }
  0x10   :  { %230 = vmatprep.subr.bf16.mxu0 %v299_v1  ;;  %238 = vmatprep.subr.bf16.mxu1 %v299_v1  ;;  %v29_v3 = vld [vmem:[%s380_s1] sm:$0xff]  ;;  %v257_v5 = vld [vmem:[%s383_s4 + $0x8] sm:$0xff]  }
  0x11   :  { %231 = vmatpush3.bf16.msra.mxu0 %v254_v0  ;;  %234 = vmatprep.mubr.msk.bf16.mxu0 %vm300_vm0, %v299_v1  ;;  %v256_v4 = vld [vmem:[%s383_s4] sm:$0xff]   ;;  %v30_v6 = vpack.c.bf16 %v29_v3, %v29_v3 }
  0x12   :  { %232 = vmatprep.subr.bf16.mxu0 %v299_v1  ;;  %246 = vmatprep.mubr.msk.bf16.mxu1 %vm300_vm0, %v299_v1 }
  0x13   :  { %239 = vmatpush3.bf16.msra.mxu1 %v256_v4 }
  0x14   :  { %240 = vmatprep.subr.bf16.mxu1 %v299_v1 }
  0x15   :  { %233 = vmatpush3.bf16.msra.mxu0 %v255_v2 }
  0x16   :  { %17 = vsyncpa [#allocation5], 0  ;;  %v258_v7 = vld [vmem:[%s383_s4 + $0x10] sm:$0xff]   ;;  %v259_v8 = vld [vmem:[%s383_s4 + $0x18] sm:$0xff]   ;;  %vm139_vm2 = vcmask 523264   ;;  %s183_s15 = sld [smem:[#allocation3]]  ;;  %v185_v17 = vlaneseq }
  0x17   :  { %241 = vmatpush3.bf16.msra.mxu1 %v257_v5  ;;  %v211_v9 = vld [vmem:[%s382_s3] ss:$0 sm:$0xff]  ;;  %s221_s16 = sld [smem:[#allocation3 + $0x1]]  ;;  %s301_s3 = smov [#allocation4]   ;;  %vm195_vm6 = vcmask 130048  }
  0x18   :  { %235 = vmatmul.mubr.msk.bf16.vlgmr.msra.gmra.mrb[0].mxu0 %vm54_vm1, %v30_v6  ;;  %242 = vmatprep.subr.bf16.mxu1 %v299_v1  ;;  %v186_v18 = vand.u32 127, %v185_v17  ;;  %v215_v21 = vld [vmem:[%s384_s5] ss:$0 sm:$0xff]  ;;  %s203_s18 = sshll.u32 %s301_s3, 4  ;;  %s204_s18 = int_to_ptr.vmem [resolvable:$true] %s203_s18 }
  0x19   :  { %s272_s19 = scalar_lea.vmem %s204_s18, 128  ;;  %p277_p6 = scmp.lt.s32.totalorder %s204_s18, %s204_s18 }
  0x1a   :  { %p273_p5 = scmp.ne.s32.totalorder %s204_s18, %s272_s19  ;;  %p278_p7 = scmp.lt.s32.totalorder %s272_s19, %s272_s19 }
  0x1b   :  { %243 = vmatpush3.bf16.msra.mxu1 %v258_v7 }
  0x1c   :  { %244 = vmatprep.subr.bf16.mxu1 %v299_v1  ;;  %v187_v19 = vstv %s183_s15  ;;  %p279_p8 = por %p278_p7, %p277_p6 }
  0x1d   :  { %v189_v20 = vstv %s221_s16  ;;  %vm188_vm3 = vcmp.ge.s32.totalorder %v186_v18, %v187_v19 }
  0x1e   :  { %vm190_vm4 = vcmp.lt.s32.totalorder %v186_v18, %v189_v20  ;;  %p280_p9 = pnand %p279_p8, %p273_p5 }
  0x1f   :  { %245 = vmatpush3.bf16.msra.mxu1 %v259_v8  ;;  %vm191_vm5 = vmand %vm188_vm3, %vm190_vm4 }
  0xeb   :  { %v92_v10 = vpop.f32.mrb[0].mxu0 }
  0xec   :  { %v93_v11 = vadd.f32 %v211_v9, %v92_v10  ;;  %v236_v12 = vpop.f32.mrb[1].mxu0 }
  0xed   :  { %v95_v13 = vpop.f32.mrb[2].mxu0 }
  0xee   :  { %v98_v14 = vmax.f32 %v93_v11, 0.0  ;;  %v237_v15 = vpop.f32.mrb[3].mxu0 }
  0xf0   :  { %v99_v16 = vpack.c.bf16 %v98_v14, %v98_v14 }
  0xf2   :  { %247 = vmatmul.mubr.msk.bf16.vlgmr.msra.gmra.mrb[0].mxu1 %vm139_vm2, %v99_v16 }
 0x1c5   :  { %v177_v22 = vpop.f32.mrb[0].mxu1 }
 0x1c6   :  { %v178_v23 = vadd.f32 %v215_v21, %v177_v22  ;;  %v248_v24 = vpop.f32.mrb[1].mxu1 }
 0x1c7   :  { %v180_v25 = vpop.f32.mrb[2].mxu1 }
 0x1c8   :  { %v194_v26 = vsel %vm191_vm5, %v178_v23, -1e+11  ;;  %v249_v27 = vpop.f32.mrb[3].mxu1 }
 0x1c9   :  { %196 = vst.msk [vmem:[#allocation4] sm:$0xff] %vm195_vm6, %v194_v26 }
 0x1ca   :  { %283 = shalt.err (!%p280_p9)
}
 0x1cb   :  { %s284_s21 = scalar_lea.hbm %s385_s6, 128 }
 0x1cc   :  { %p285_p10 = scmp.ne.s32.totalorder %s385_s6, %s284_s21  ;;  %p288_p11 = scmp.lt.u32.totalorder %s284_s21, %s385_s6 }
 0x1ce   :  { %p290_p12 = pnand %p288_p11, %p285_p10 }
 0x1d0   :  { %293 = shalt.err (!%p290_p12)
}
 0x1d1   :  { %206 = dma.vmem_to_hbm [thread:$0]  %s204_s18, 128, %s385_s6, [#allocation5]  }
 0x1d2   :  { %296 = dma.done.wait [#allocation5], 128  }
 0x1d3   :  { %297 = vsyncadd [#allocation5], 4294967168 }
 0x1d4   :  { %210 = vsyncpa [#allocation5], 1 }

</bundles_post_ra>
